<compile_context>
chip_gen: v7x
topology: tpu7x:2x2x1
jax: 0.10.0
libtpu: 0.0.40
codegen_flags: <defaults>
</compile_context>

<pallas_src>
import jax
import jax.numpy as jnp
from jax.experimental import pallas as pl
from jax.experimental.pallas import tpu as pltpu


def _round_up(a, b):
    return ((a + b - 1) // b) * b


def make_resnet_potential_kernel(num_hidden_layers):
    """Per-tile kernel: full hidden stack + row-sums of h and x.

    Refs (in order): x (T, x_dim), WX (1+nh, x_dim, H), YB (1+nh, 1, H),
                     WH (max(nh-1,1), H, H), VEC (3*nh, 1, H),
                     ph (1, 1, H), px (1, 1, x_dim).
    """
    nh = num_hidden_layers

    def kernel(x_ref, wx_ref, yb_ref, wh_ref, vec_ref, ph_ref, px_ref):
        x = x_ref[...]                                            # (T, x_dim)
        h = None
        for li in range(nh):
            if li == 0:
                z = (jnp.dot(x, wx_ref[0], preferred_element_type=jnp.float32)
                     + yb_ref[0])                                 # (T, H)
            else:
                z = (jnp.dot(h, wh_ref[li - 1],
                             preferred_element_type=jnp.float32)
                     + vec_ref[3 * li + 2])                       # b_li
            gamma = vec_ref[3 * li]
            beta = vec_ref[3 * li + 1]
            mu = jnp.mean(z, axis=-1, keepdims=True)
            var = jnp.mean(jnp.square(z - mu), axis=-1, keepdims=True)
            zn = (z - mu) * jax.lax.rsqrt(var + 1e-5) * gamma + beta
            # Residual branch: x @ rW_li_x + (y @ rW_li_y + rb_li).
            r = (jnp.dot(x, wx_ref[1 + li], preferred_element_type=jnp.float32)
                 + yb_ref[1 + li])
            h = jnp.tanh(zn) + r

        # Per-tile partials; the final affine stage + mean are folded through
        # these row-sums in the wrapper.
        ph_ref[...] = jnp.sum(h, axis=0, keepdims=True)[None]     # (1,1,H)
        px_ref[...] = jnp.sum(x, axis=0, keepdims=True)[None]     # (1,1,x_dim)

    return kernel


def init_params(key, in_channels, num_layers, out_channels):
    """Deterministic synthetic init mirroring torch.nn.Linear / LayerNorm defaults."""
    sizes = [in_channels] + list(num_layers) + [out_channels]
    n_hidden = len(num_layers)
    keys = iter(jax.random.split(key, 4 * n_hidden + 4))

    def lin(in_f, out_f):
        bound = 1.0 / (in_f ** 0.5)
        w = jax.random.uniform(next(keys), (in_f, out_f), jnp.float32, -bound, bound)
        b = jax.random.uniform(next(keys), (1, out_f), jnp.float32, -bound, bound)
        return w, b

    flat = []
    for i in range(n_hidden):
        w, b = lin(sizes[i], sizes[i + 1])
        g = jnp.ones((1, sizes[i + 1]), jnp.float32)     # LayerNorm weight
        be = jnp.zeros((1, sizes[i + 1]), jnp.float32)   # LayerNorm bias
        rw, rb = lin(in_channels, sizes[i + 1])          # res_trans[i]
        flat += [w, b, g, be, rw, rb]
    w, b = lin(sizes[-2], sizes[-1])                     # final Linear
    rw, rb = lin(in_channels, sizes[-1])                 # res_trans[-1]
    flat += [w, b, rw, rb]
    return flat


def pack_params(params_flat, num_layers, out_channels, x_dim):
    """Pack the flat torch-style param list into stacked arrays (done once)."""
    hs = list(num_layers)
    nh = len(hs)
    assert all(h == hs[0] for h in hs), "stacked packing requires uniform hidden width"
    H = hs[0]

    off = 0
    Ws, bs, gs, betas, rWs, rbs = [], [], [], [], [], []
    for _ in range(nh):
        w, b, g, be, rw, rb = params_flat[off:off + 6]
        off += 6
        Ws.append(w); bs.append(b); gs.append(g); betas.append(be)
        rWs.append(rw); rbs.append(rb)
    wf, bf, rwf, rbf = params_flat[off:off + 4]

    # Row-split (x vs y) of every matmul whose LHS is inp = [x | y].
    WX = jnp.stack([Ws[0][:x_dim]] + [rw[:x_dim] for rw in rWs], axis=0)
    WY = jnp.stack([Ws[0][x_dim:]] + [rw[x_dim:] for rw in rWs], axis=0)
    BI = jnp.stack([bs[0]] + rbs, axis=0)                          # (1+nh, 1, H)
    # Hidden-layer weights for layers 1..nh-1 (dummy, unused entry when nh==1).
    WH = (jnp.stack(Ws[1:], axis=0) if nh > 1
          else jnp.zeros((1, H, H), jnp.float32))
    # Per-layer vectors: rows 3i / 3i+1 / 3i+2 = gamma_i / beta_i / b_i
    # (b_0 is already folded into BI[0], its slot stays zero / unused).
    rows = []
    for i in range(nh):
        rows += [gs[i], betas[i], bs[i] if i > 0 else jnp.zeros_like(bs[i])]
    VEC = jnp.stack(rows, axis=0)                                  # (3*nh, 1, H)

    return dict(WX=WX, WY=WY, BI=BI, WH=WH, VEC=VEC,
                WF=wf, RWF_X=rwf[:x_dim], RWF_Y=rwf[x_dim:], BSUM=bf + rbf)


def _padded_row_hidden(yb, wh, vec, nh):
    """Hidden output of a single row with x = 0 (pure JAX, runs once at finalize)."""
    h = None
    for li in range(nh):
        z = yb[0] if li == 0 else (h @ wh[li - 1] + vec[3 * li + 2])
        mu = jnp.mean(z, axis=-1, keepdims=True)
        var = jnp.mean(jnp.square(z - mu), axis=-1, keepdims=True)
        zn = (z - mu) * jax.lax.rsqrt(var + 1e-5) * vec[3 * li] + vec[3 * li + 1]
        h = jnp.tanh(zn) + yb[1 + li]
    return h                                                        # (1, H)


def resnet_potential_forward(x, y, packed, *, num_layers, out_channels,
                             index=None, tile_n=4096):
    if index is not None:
        # Reference semantics: with an index the MLP output is discarded and
        # the module returns scatter_mean(x, index).sum().  Data-dependent
        # output size -> plain JAX (device_get forces a host sync).
        # TODO(synk): no Pallas kernel for this data-dependent scatter path.
        size = int(jax.device_get(index).max()) + 1
        sums = jnp.zeros((size, x.shape[1]), x.dtype).at[index].add(x)
        cnt = jnp.zeros((size,), x.dtype).at[index].add(1.0)
        return (sums / jnp.maximum(cnt, 1.0)[:, None]).sum()

    hs = list(num_layers)
    nh = len(hs)
    H = hs[0]
    n, x_dim = x.shape
    wx, whk, vec = packed['WX'], packed['WH'], packed['VEC']

    # Per-call y-dependent bias rows (first layer + every residual branch),
    # computed ONCE here instead of in every grid step.
    yb = (jnp.einsum('od,kdh->koh', y.astype(jnp.float32), packed['WY'])
          + packed['BI'])                                           # (1+nh, 1, H)

    # Row tiling: zero-pad the tail; the padded rows' (identical) contribution
    # is subtracted at finalize, so the kernel needs no per-step masking.
    t = min(tile_n, _round_up(n, 8))
    n_pad = _round_up(n, t)
    xp = jnp.pad(x, ((0, n_pad - n), (0, 0))) if n_pad != n else x
    grid_n = n_pad // t

    kernel = make_resnet_potential_kernel(nh)
    ph, px = pl.pallas_call(
        kernel,
        out_shape=(jax.ShapeDtypeStruct((grid_n, 1, H), jnp.float32),
                   jax.ShapeDtypeStruct((grid_n, 1, x_dim), jnp.float32)),
        grid_spec=pltpu.PrefetchScalarGridSpec(
            num_scalar_prefetch=0,
            grid=(grid_n,),
            in_specs=[
                pl.BlockSpec((t, x_dim), lambda i: (i, 0)),        # x: tiled over N
                pl.BlockSpec(wx.shape, lambda i: (0, 0, 0)),       # params: resident
                pl.BlockSpec(yb.shape, lambda i: (0, 0, 0)),
                pl.BlockSpec(whk.shape, lambda i: (0, 0, 0)),
                pl.BlockSpec(vec.shape, lambda i: (0, 0, 0)),
            ],
            out_specs=[
                pl.BlockSpec((1, 1, H), lambda i: (i, 0, 0)),      # per-tile sum_rows(h)
                pl.BlockSpec((1, 1, x_dim), lambda i: (i, 0, 0)),  # per-tile sum_rows(x)
            ],
        ),
        compiler_params=pltpu.CompilerParams(
            dimension_semantics=("parallel",),        # independent tiles (both v7x TCs)
            vmem_limit_bytes=48 * 1024 * 1024),
    )(xp, wx, yb, whk, vec)

    # Finalize (tiny): mean of the affine last stage folded through row-sums.
    sh = ph.sum(axis=(0, 1))                                        # (H,)
    sx = px.sum(axis=(0, 1))                                        # (x_dim,)
    if n_pad != n:
        # Every padded row has x = 0, so its hidden output is one fixed row.
        h_pad = _padded_row_hidden(yb, whk, vec, nh)                # (1, H)
        sh = sh - float(n_pad - n) * h_pad[0]
    total = ((sh @ packed['WF']).sum()
             + (sx @ packed['RWF_X']).sum()
             + float(n) * (packed['BSUM'] + y @ packed['RWF_Y']).sum())
    return total / float(n * out_channels)


def reference_forward(x, y, params_flat, num_layers):
    """Pure-JAX mirror of the PyTorch forward (index=None) for validation."""
    n_hidden = len(num_layers)
    inp = jnp.concatenate(
        [x, jnp.broadcast_to(y, (x.shape[0], y.shape[-1]))], axis=1)
    h = inp
    off = 0
    for _ in range(n_hidden):
        w, b, g, be, rw, rb = params_flat[off:off + 6]
        off += 6
        z = h @ w + b
        mu = jnp.mean(z, axis=-1, keepdims=True)
        var = jnp.mean(jnp.square(z - mu), axis=-1, keepdims=True)
        z = (z - mu) / jnp.sqrt(var + 1e-5) * g + be
        h = jnp.tanh(z) + (inp @ rw + rb)
    w, b, rw, rb = params_flat[off:off + 4]
    h = (h @ w + b) + (inp @ rw + rb)
    return jnp.mean(h)


if __name__ == "__main__":
    key = jax.random.PRNGKey(0)
    kx, ky, kp = jax.random.split(key, 3)

    # Small shapes consistent with the module; N and tile_n chosen so the
    # multi-tile ("parallel") path and the padded-tail correction are exercised.
    N, x_dim, y_dim = 200, 24, 8
    in_channels = x_dim + y_dim            # 32
    num_layers = [32, 32]
    out_channels = 1

    x = jax.random.normal(kx, (N, x_dim), jnp.float32)
    y = jax.random.normal(ky, (1, y_dim), jnp.float32)
    params = init_params(kp, in_channels, num_layers, out_channels)
    packed = pack_params(params, num_layers, out_channels, x_dim)

    fwd = jax.jit(lambda x_, y_, p_: resnet_potential_forward(
        x_, y_, p_, num_layers=num_layers, out_channels=out_channels,
        index=None, tile_n=64))
    out = jax.block_until_ready(fwd(x, y, packed))

    ref = reference_forward(x, y, params, num_layers)
    assert jnp.allclose(out, ref, rtol=1e-4, atol=1e-4), (float(out), float(ref))
    print("KERNEL_OK")
</pallas_src>

<mosaic_0001>
module attributes {stable_mosaic.version = 11 : i64} {
  func.func @kernel(%arg0: i32, %arg1: memref<64x24xf32, #tpu.memory_space<vmem>>, %arg2: memref<3x24x32xf32, #tpu.memory_space<vmem>>, %arg3: memref<3x1x32xf32, #tpu.memory_space<vmem>>, %arg4: memref<1x32x32xf32, #tpu.memory_space<vmem>>, %arg5: memref<6x1x32xf32, #tpu.memory_space<vmem>>, %arg6: memref<1x1x32xf32, #tpu.memory_space<vmem>>, %arg7: memref<1x1x24xf32, #tpu.memory_space<vmem>>) attributes {dimension_semantics = [#tpu.dimension_semantics<parallel>], iteration_bounds = array<i64: 4>, scalar_prefetch = 0 : i64, scratch_operands = 0 : i64, tpu.core_type = #tpu.core_type<tc>, window_params = [{transform_indices = @transform_0, window_bounds = array<i64: 64, 24>}, {pipeline_mode = #tpu.pipeline_mode<synchronous>, transform_indices = @transform_1, window_bounds = array<i64: 3, 24, 32>}, {pipeline_mode = #tpu.pipeline_mode<synchronous>, transform_indices = @transform_2, window_bounds = array<i64: 3, 1, 32>}, {pipeline_mode = #tpu.pipeline_mode<synchronous>, transform_indices = @transform_3, window_bounds = array<i64: 1, 32, 32>}, {pipeline_mode = #tpu.pipeline_mode<synchronous>, transform_indices = @transform_4, window_bounds = array<i64: 6, 1, 32>}, {transform_indices = @transform_5, window_bounds = array<i64: 1, 1, 32>}, {transform_indices = @transform_6, window_bounds = array<i64: 1, 1, 24>}]} {
    %c0 = arith.constant 0 : index
    %c0_0 = arith.constant 0 : index
    %0 = vector.load %arg1[%c0, %c0_0] : memref<64x24xf32, #tpu.memory_space<vmem>>, vector<64x24xf32>
    %c0_1 = arith.constant 0 : index
    %c0_2 = arith.constant 0 : index
    %c0_3 = arith.constant 0 : index
    %1 = vector.load %arg2[%c0_1, %c0_2, %c0_3] : memref<3x24x32xf32, #tpu.memory_space<vmem>>, vector<1x24x32xf32>
    %2 = vector.shape_cast %1 : vector<1x24x32xf32> to vector<24x32xf32>
    %cst = arith.constant dense<0.000000e+00> : vector<64x32xf32>
    %3 = tpu.matmul %0, %2, %cst {dimension_numbers = #tpu.dot_dimension_numbers<[1], [0], [0], [1], [0, 0, 1, 1], [], []>} : vector<64x24xf32>, vector<24x32xf32>, vector<64x32xf32> -> vector<64x32xf32>
    %c0_4 = arith.constant 0 : index
    %c0_5 = arith.constant 0 : index
    %c0_6 = arith.constant 0 : index
    %4 = vector.load %arg3[%c0_4, %c0_5, %c0_6] : memref<3x1x32xf32, #tpu.memory_space<vmem>>, vector<1x1x32xf32>
    %5 = vector.shape_cast %4 : vector<1x1x32xf32> to vector<1x32xf32>
    %6 = vector.broadcast %5 : vector<1x32xf32> to vector<64x32xf32>
    %7 = arith.addf %3, %6 : vector<64x32xf32>
    %c0_7 = arith.constant 0 : index
    %c0_8 = arith.constant 0 : index
    %c0_9 = arith.constant 0 : index
    %8 = vector.load %arg5[%c0_7, %c0_8, %c0_9] : memref<6x1x32xf32, #tpu.memory_space<vmem>>, vector<1x1x32xf32>
    %9 = vector.shape_cast %8 : vector<1x1x32xf32> to vector<1x32xf32>
    %c1 = arith.constant 1 : index
    %c0_10 = arith.constant 0 : index
    %c0_11 = arith.constant 0 : index
    %10 = vector.load %arg5[%c1, %c0_10, %c0_11] : memref<6x1x32xf32, #tpu.memory_space<vmem>>, vector<1x1x32xf32>
    %11 = vector.shape_cast %10 : vector<1x1x32xf32> to vector<1x32xf32>
    %cst_12 = arith.constant dense<0.000000e+00> : vector<64xf32>
    %12 = vector.multi_reduction <add>, %7, %cst_12 [1] : vector<64x32xf32> to vector<64xf32>
    %13 = vector.shape_cast %12 : vector<64xf32> to vector<64x1xf32>
    %cst_13 = arith.constant 3.200000e+01 : f32
    %14 = vector.broadcast %cst_13 : f32 to vector<64x1xf32>
    %15 = arith.divf %13, %14 : vector<64x1xf32>
    %16 = vector.broadcast %15 : vector<64x1xf32> to vector<64x32xf32>
    %17 = arith.subf %7, %16 : vector<64x32xf32>
    %18 = arith.mulf %17, %17 : vector<64x32xf32>
    %cst_14 = arith.constant dense<0.000000e+00> : vector<64xf32>
    %19 = vector.multi_reduction <add>, %18, %cst_14 [1] : vector<64x32xf32> to vector<64xf32>
    %20 = vector.shape_cast %19 : vector<64xf32> to vector<64x1xf32>
    %cst_15 = arith.constant 3.200000e+01 : f32
    %21 = vector.broadcast %cst_15 : f32 to vector<64x1xf32>
    %22 = arith.divf %20, %21 : vector<64x1xf32>
    %23 = vector.broadcast %15 : vector<64x1xf32> to vector<64x32xf32>
    %24 = arith.subf %7, %23 : vector<64x32xf32>
    %cst_16 = arith.constant 9.99999974E-6 : f32
    %25 = vector.broadcast %cst_16 : f32 to vector<64x1xf32>
    %26 = arith.addf %22, %25 : vector<64x1xf32>
    %27 = math.rsqrt %26 : vector<64x1xf32>
    %28 = vector.broadcast %27 : vector<64x1xf32> to vector<64x32xf32>
    %29 = arith.mulf %24, %28 : vector<64x32xf32>
    %30 = vector.broadcast %9 : vector<1x32xf32> to vector<64x32xf32>
    %31 = arith.mulf %29, %30 : vector<64x32xf32>
    %32 = vector.broadcast %11 : vector<1x32xf32> to vector<64x32xf32>
    %33 = arith.addf %31, %32 : vector<64x32xf32>
    %c1_17 = arith.constant 1 : index
    %c0_18 = arith.constant 0 : index
    %c0_19 = arith.constant 0 : index
    %34 = vector.load %arg2[%c1_17, %c0_18, %c0_19] : memref<3x24x32xf32, #tpu.memory_space<vmem>>, vector<1x24x32xf32>
    %35 = vector.shape_cast %34 : vector<1x24x32xf32> to vector<24x32xf32>
    %cst_20 = arith.constant dense<0.000000e+00> : vector<64x32xf32>
    %36 = tpu.matmul %0, %35, %cst_20 {dimension_numbers = #tpu.dot_dimension_numbers<[1], [0], [0], [1], [0, 0, 1, 1], [], []>} : vector<64x24xf32>, vector<24x32xf32>, vector<64x32xf32> -> vector<64x32xf32>
    %c1_21 = arith.constant 1 : index
    %c0_22 = arith.constant 0 : index
    %c0_23 = arith.constant 0 : index
    %37 = vector.load %arg3[%c1_21, %c0_22, %c0_23] : memref<3x1x32xf32, #tpu.memory_space<vmem>>, vector<1x1x32xf32>
    %38 = vector.shape_cast %37 : vector<1x1x32xf32> to vector<1x32xf32>
    %39 = vector.broadcast %38 : vector<1x32xf32> to vector<64x32xf32>
    %40 = arith.addf %36, %39 : vector<64x32xf32>
    %41 = math.tanh %33 : vector<64x32xf32>
    %42 = arith.addf %41, %40 : vector<64x32xf32>
    %c0_24 = arith.constant 0 : index
    %c0_25 = arith.constant 0 : index
    %c0_26 = arith.constant 0 : index
    %43 = vector.load %arg4[%c0_24, %c0_25, %c0_26] : memref<1x32x32xf32, #tpu.memory_space<vmem>>, vector<1x32x32xf32>
    %44 = vector.shape_cast %43 : vector<1x32x32xf32> to vector<32x32xf32>
    %cst_27 = arith.constant dense<0.000000e+00> : vector<64x32xf32>
    %45 = tpu.matmul %42, %44, %cst_27 {dimension_numbers = #tpu.dot_dimension_numbers<[1], [0], [0], [1], [0, 0, 1, 1], [], []>} : vector<64x32xf32>, vector<32x32xf32>, vector<64x32xf32> -> vector<64x32xf32>
    %c5 = arith.constant 5 : index
    %c0_28 = arith.constant 0 : index
    %c0_29 = arith.constant 0 : index
    %46 = vector.load %arg5[%c5, %c0_28, %c0_29] : memref<6x1x32xf32, #tpu.memory_space<vmem>>, vector<1x1x32xf32>
    %47 = vector.shape_cast %46 : vector<1x1x32xf32> to vector<1x32xf32>
    %48 = vector.broadcast %47 : vector<1x32xf32> to vector<64x32xf32>
    %49 = arith.addf %45, %48 : vector<64x32xf32>
    %c3 = arith.constant 3 : index
    %c0_30 = arith.constant 0 : index
    %c0_31 = arith.constant 0 : index
    %50 = vector.load %arg5[%c3, %c0_30, %c0_31] : memref<6x1x32xf32, #tpu.memory_space<vmem>>, vector<1x1x32xf32>
    %51 = vector.shape_cast %50 : vector<1x1x32xf32> to vector<1x32xf32>
    %c4 = arith.constant 4 : index
    %c0_32 = arith.constant 0 : index
    %c0_33 = arith.constant 0 : index
    %52 = vector.load %arg5[%c4, %c0_32, %c0_33] : memref<6x1x32xf32, #tpu.memory_space<vmem>>, vector<1x1x32xf32>
    %53 = vector.shape_cast %52 : vector<1x1x32xf32> to vector<1x32xf32>
    %cst_34 = arith.constant dense<0.000000e+00> : vector<64xf32>
    %54 = vector.multi_reduction <add>, %49, %cst_34 [1] : vector<64x32xf32> to vector<64xf32>
    %55 = vector.shape_cast %54 : vector<64xf32> to vector<64x1xf32>
    %cst_35 = arith.constant 3.200000e+01 : f32
    %56 = vector.broadcast %cst_35 : f32 to vector<64x1xf32>
    %57 = arith.divf %55, %56 : vector<64x1xf32>
    %58 = vector.broadcast %57 : vector<64x1xf32> to vector<64x32xf32>
    %59 = arith.subf %49, %58 : vector<64x32xf32>
    %60 = arith.mulf %59, %59 : vector<64x32xf32>
    %cst_36 = arith.constant dense<0.000000e+00> : vector<64xf32>
    %61 = vector.multi_reduction <add>, %60, %cst_36 [1] : vector<64x32xf32> to vector<64xf32>
    %62 = vector.shape_cast %61 : vector<64xf32> to vector<64x1xf32>
    %cst_37 = arith.constant 3.200000e+01 : f32
    %63 = vector.broadcast %cst_37 : f32 to vector<64x1xf32>
    %64 = arith.divf %62, %63 : vector<64x1xf32>
    %65 = vector.broadcast %57 : vector<64x1xf32> to vector<64x32xf32>
    %66 = arith.subf %49, %65 : vector<64x32xf32>
    %cst_38 = arith.constant 9.99999974E-6 : f32
    %67 = vector.broadcast %cst_38 : f32 to vector<64x1xf32>
    %68 = arith.addf %64, %67 : vector<64x1xf32>
    %69 = math.rsqrt %68 : vector<64x1xf32>
    %70 = vector.broadcast %69 : vector<64x1xf32> to vector<64x32xf32>
    %71 = arith.mulf %66, %70 : vector<64x32xf32>
    %72 = vector.broadcast %51 : vector<1x32xf32> to vector<64x32xf32>
    %73 = arith.mulf %71, %72 : vector<64x32xf32>
    %74 = vector.broadcast %53 : vector<1x32xf32> to vector<64x32xf32>
    %75 = arith.addf %73, %74 : vector<64x32xf32>
    %c2 = arith.constant 2 : index
    %c0_39 = arith.constant 0 : index
    %c0_40 = arith.constant 0 : index
    %76 = vector.load %arg2[%c2, %c0_39, %c0_40] : memref<3x24x32xf32, #tpu.memory_space<vmem>>, vector<1x24x32xf32>
    %77 = vector.shape_cast %76 : vector<1x24x32xf32> to vector<24x32xf32>
    %cst_41 = arith.constant dense<0.000000e+00> : vector<64x32xf32>
    %78 = tpu.matmul %0, %77, %cst_41 {dimension_numbers = #tpu.dot_dimension_numbers<[1], [0], [0], [1], [0, 0, 1, 1], [], []>} : vector<64x24xf32>, vector<24x32xf32>, vector<64x32xf32> -> vector<64x32xf32>
    %c2_42 = arith.constant 2 : index
    %c0_43 = arith.constant 0 : index
    %c0_44 = arith.constant 0 : index
    %79 = vector.load %arg3[%c2_42, %c0_43, %c0_44] : memref<3x1x32xf32, #tpu.memory_space<vmem>>, vector<1x1x32xf32>
    %80 = vector.shape_cast %79 : vector<1x1x32xf32> to vector<1x32xf32>
    %81 = vector.broadcast %80 : vector<1x32xf32> to vector<64x32xf32>
    %82 = arith.addf %78, %81 : vector<64x32xf32>
    %83 = math.tanh %75 : vector<64x32xf32>
    %84 = arith.addf %83, %82 : vector<64x32xf32>
    %cst_45 = arith.constant dense<0.000000e+00> : vector<32xf32>
    %85 = vector.multi_reduction <add>, %84, %cst_45 [0] : vector<64x32xf32> to vector<32xf32>
    %86 = vector.shape_cast %85 : vector<32xf32> to vector<1x32xf32>
    %87 = vector.shape_cast %86 : vector<1x32xf32> to vector<1x1x32xf32>
    %c0_46 = arith.constant 0 : index
    %c0_47 = arith.constant 0 : index
    %c0_48 = arith.constant 0 : index
    %88 = vector.load %arg6[%c0_46, %c0_47, %c0_48] : memref<1x1x32xf32, #tpu.memory_space<vmem>>, vector<1x1x32xf32>
    tpu.vector_store %arg6[%c0_46, %c0_47, %c0_48], %87 {strides = array<i32>} : memref<1x1x32xf32, #tpu.memory_space<vmem>>, vector<1x1x32xf32>,
    %cst_49 = arith.constant dense<0.000000e+00> : vector<24xf32>
    %89 = vector.multi_reduction <add>, %0, %cst_49 [0] : vector<64x24xf32> to vector<24xf32>
    %90 = vector.shape_cast %89 : vector<24xf32> to vector<1x24xf32>
    %91 = vector.shape_cast %90 : vector<1x24xf32> to vector<1x1x24xf32>
    %c0_50 = arith.constant 0 : index
    %c0_51 = arith.constant 0 : index
    %c0_52 = arith.constant 0 : index
    %92 = vector.load %arg7[%c0_50, %c0_51, %c0_52] : memref<1x1x24xf32, #tpu.memory_space<vmem>>, vector<1x1x24xf32>
    tpu.vector_store %arg7[%c0_50, %c0_51, %c0_52], %91 {strides = array<i32>} : memref<1x1x24xf32, #tpu.memory_space<vmem>>, vector<1x1x24xf32>,
    return
  }
  func.func @transform_0(%arg0: i32) -> (i32, i32) {
    %c0_i32 = arith.constant 0 : i32
    %c0_i32_0 = arith.constant 0 : i32
    return %arg0, %c0_i32 : i32, i32
  }
  func.func @transform_1(%arg0: i32) -> (i32, i32, i32) {
    %c0_i32 = arith.constant 0 : i32
    %c0_i32_0 = arith.constant 0 : i32
    %c0_i32_1 = arith.constant 0 : i32
    %c0_i32_2 = arith.constant 0 : i32
    return %c0_i32, %c0_i32_0, %c0_i32_1 : i32, i32, i32
  }
  func.func @transform_2(%arg0: i32) -> (i32, i32, i32) {
    %c0_i32 = arith.constant 0 : i32
    %c0_i32_0 = arith.constant 0 : i32
    %c0_i32_1 = arith.constant 0 : i32
    %c0_i32_2 = arith.constant 0 : i32
    return %c0_i32, %c0_i32_0, %c0_i32_1 : i32, i32, i32
  }
  func.func @transform_3(%arg0: i32) -> (i32, i32, i32) {
    %c0_i32 = arith.constant 0 : i32
    %c0_i32_0 = arith.constant 0 : i32
    %c0_i32_1 = arith.constant 0 : i32
    %c0_i32_2 = arith.constant 0 : i32
    return %c0_i32, %c0_i32_0, %c0_i32_1 : i32, i32, i32
  }
  func.func @transform_4(%arg0: i32) -> (i32, i32, i32) {
    %c0_i32 = arith.constant 0 : i32
    %c0_i32_0 = arith.constant 0 : i32
    %c0_i32_1 = arith.constant 0 : i32
    %c0_i32_2 = arith.constant 0 : i32
    return %c0_i32, %c0_i32_0, %c0_i32_1 : i32, i32, i32
  }
  func.func @transform_5(%arg0: i32) -> (i32, i32, i32) {
    %c0_i32 = arith.constant 0 : i32
    %c0_i32_0 = arith.constant 0 : i32
    %c0_i32_1 = arith.constant 0 : i32
    return %arg0, %c0_i32, %c0_i32_0 : i32, i32, i32
  }
  func.func @transform_6(%arg0: i32) -> (i32, i32, i32) {
    %c0_i32 = arith.constant 0 : i32
    %c0_i32_0 = arith.constant 0 : i32
    %c0_i32_1 = arith.constant 0 : i32
    return %arg0, %c0_i32, %c0_i32_0 : i32, i32, i32
  }
}

</mosaic_0001>

<bundles_post_ra>
// kernel: _lambda_.1
= control target key start
LH: loop header
LB: loop body
LE: loop exit
PB: predicated region body
PF: predicated region fallthrough
CT: control target
= control target key end

     0   :  { %s1520_s21 = smov 0   ;;  %s1862_s0 = inlined_call_operand.vmem [shape: f32[256,24], index: 0, kind: input, shape index: {}]   ;;  %s1863_s1 = inlined_call_operand.vmem [shape: f32[3,24,32], index: 1, kind: input, shape index: {}]   ;;  %s1864_s2 = inlined_call_operand.vmem [shape: f32[3,1,32], index: 2, kind: input, shape index: {}]   ;;  %s1865_s3 = inlined_call_operand.vmem [shape: f32[1,32,32], index: 3, kind: input, shape index: {}]   ;;  %s1866_s4 = inlined_call_operand.vmem [shape: f32[6,1,32], index: 4, kind: input, shape index: {}]   ;;  %s1867_s5 = inlined_call_operand.vmem [shape: f32[4,1,32], index: 5, kind: output, shape index: {0}]   ;;  %s1868_s6 = inlined_call_operand.vmem [shape: f32[4,1,24], index: 6, kind: output, shape index: {1}]  }
   0x1 LB: > { %s1526_s22 = sadd.s32 4294967295, %s1483_s21   ;;  %p1209_p0 = scmp.ge.s32.totalorder %s1483_s21, 1  ;;  %s1483_s21 = sphi %s1520_s21, %s17_s21  }
   0x2   : > { %p216_p1 = scmp.lt.s32.totalorder %s1483_s21, 5 }
   0x4   : > { %p217_p2 = pnand %p1209_p0, %p216_p1 }
   0x5   : > { %v267_v0 = vld [vmem:[%s1863_s1] sm:$0xff] (!%p217_p2)  ;;  %v268_v1 = vld [vmem:[%s1863_s1 + $0x8] sm:$0xff] (!%p217_p2)  ;;  %s1210_s27 = sshll.u32 (!%p217_p2), %s1526_s22, 3  ;;  %v269_v3 = vld [vmem:[%s1863_s1 + $0x10] sm:$0xff] (!%p217_p2)  ;;  %vm277_vm0 = vcmask (!%p217_p2), 195584   ;;  %p253_p4 = scmp.lt.s32.totalorder (!%p217_p2), %s1526_s22, 3 }
   0x6   : > { %220 = sbr.rel (%p217_p2) target bundleno = 1134 (0x46e), region = 40  ;;  %v1385_v2 = vpack.c.bf16 (!%p217_p2), %v268_v1, %v267_v0  ;;  %p248_p3 = scmp.lt.s32.totalorder (!%p217_p2), %s1210_s27, 31  ;;  %vm1131_vm1 = vcmask (!%p217_p2), 188416   ;;  %v1224_v33 = vld [vmem:[%s1863_s1 + $0x18] sm:$0xff] (!%p217_p2)  ;;  %v1225_v34 = vld [vmem:[%s1863_s1 + $0x20] sm:$0xff] (!%p217_p2)  ;;  %v1226_v36 = vld [vmem:[%s1863_s1 + $0x28] sm:$0xff] (!%p217_p2) }
   0x7   : > { %v1389_v35 = vpack.c.bf16 (!%p217_p2), %v1225_v34, %v1224_v33  ;;  %v1212_v37 = vld [vmem:[%s1864_s2] ss:$0 sm:$0xff] (!%p217_p2)  ;;  %vm410_vm2 = vcmask (!%p217_p2), 261120   ;;  %vm1108_vm3 = vcmask (!%p217_p2), 253952  }
   0x8   : > { %1386 = vmatprep.subr.bf16.mxu0 (!%p217_p2), %v1385_v2 }
   0x9   : > { %1388 = vmatpush3.bf16.msra.mxu0 (!%p217_p2), %v1385_v2  ;;  %1390 = vmatprep.subr.bf16.mxu1 (!%p217_p2), %v1389_v35 }
   0xa   : > { %1315 = vmatprep.subr.mxu0 (!%p217_p2), %v269_v3  ;;  %1392 = vmatpush3.bf16.msra.mxu1 (!%p217_p2), %v1389_v35 }
   0xb   : > { %1333 = vmatprep.subr.mxu1 (!%p217_p2), %v1226_v36 }
   0xd   : > { %s1870_s27 = smov (!%p248_p3, %s1210_s27), 31  ;;  %1316 = vmatpush3.msra.mxu0 %v269_v3  ;;  %s1872_s22 = smov (!%p253_p4, %s1526_s22), 3 }
   0xe   : > { %s1211_s30 = sshll.u32 %s1870_s27, 3  ;;  %s258_s12 = scalar_lea.vmem %s1868_s6, %s1872_s22  ;;  %1334 = vmatpush3.msra.mxu1 %v1226_v36 }
   0xf   : > { %s251_s9 = scalar_lea.vmem %s1862_s0, %s1211_s30  ;;  %s255_s7 = scalar_lea.vmem %s1867_s5, %s1872_s22 }
  0x10   : > { %v259_v4 = vld [vmem:[%s251_s9] sm:$0xff]  ;;  %v1543_v5 = vld [vmem:[%s251_s9 + $0x8] sm:$0xff]  ;;  %v1545_v6 = vld [vmem:[%s251_s9 + $0x10] sm:$0xff] }
  0x11   : > { %1317 = vmatprep.mubr.msk.f32.mxu0 %vm277_vm0, %v259_v4  ;;  %v1110_v7 = vsel %vm277_vm0, %v259_v4, 0.0  ;;  %v1111_v8 = vsel %vm277_vm0, %v1543_v5, 0.0  ;;  %v1113_v9 = vsel %vm277_vm0, %v1545_v6, 0.0  ;;  %v1555_v11 = vld [vmem:[%s251_s9 + $0x18] sm:$0xff]  ;;  %1335 = vmatprep.mubr.msk.f32.mxu1 %vm277_vm0, %v259_v4  ;;  %v1562_v14 = vld [vmem:[%s251_s9 + $0x20] sm:$0xff]  ;;  %v1568_v17 = vld [vmem:[%s251_s9 + $0x28] sm:$0xff] }
  0x12   : > { %1318 = vmatmul.mubr.msk.f32.vlgmr.msra.gmra.mrb[0].mxu0 %vm277_vm0, %v1543_v5  ;;  %v1112_v10 = vadd.f32 %v1111_v8, %v1110_v7  ;;  %v1115_v12 = vsel %vm277_vm0, %v1555_v11, 0.0  ;;  %v1117_v15 = vsel %vm277_vm0, %v1562_v14, 0.0  ;;  %v1119_v18 = vsel %vm277_vm0, %v1568_v17, 0.0  ;;  %v1574_v20 = vld [vmem:[%s251_s9 + $0x30] sm:$0xff]  ;;  %v1580_v23 = vld [vmem:[%s251_s9 + $0x38] sm:$0xff]  ;;  %1336 = vmatmul.mubr.msk.f32.vlgmr.msra.gmra.mrb[0].mxu1 %vm277_vm0, %v1543_v5 }
  0x13   : > { %1320 = vmatprep.mubr.msk.f32.mxu0 %vm277_vm0, %v1545_v6  ;;  %v1121_v21 = vsel %vm277_vm0, %v1574_v20, 0.0  ;;  %v1123_v24 = vsel %vm277_vm0, %v1580_v23, 0.0  ;;  %1338 = vmatprep.mubr.msk.f32.mxu1 %vm277_vm0, %v1545_v6 }
  0x14   : > { %v1114_v13 = vadd.f32 %v1113_v9, %v1112_v10 }
  0x16   : > { %1321 = vmatmul.mubr.msk.f32.gmra.mrb[2].mxu0 %vm277_vm0, %v1555_v11  ;;  %v1116_v16 = vadd.f32 %v1115_v12, %v1114_v13  ;;  %1339 = vmatmul.mubr.msk.f32.gmra.mrb[2].mxu1 %vm277_vm0, %v1555_v11 }
  0x17   : > { %1323 = vmatprep.mubr.msk.f32.mxu0 %vm277_vm0, %v1562_v14  ;;  %1341 = vmatprep.mubr.msk.f32.mxu1 %vm277_vm0, %v1562_v14 }
  0x18   : > { %v1118_v19 = vadd.f32 %v1117_v15, %v1116_v16 }
  0x1a   : > { %1324 = vmatmul.mubr.msk.f32.gmra.mrb[4].mxu0 %vm277_vm0, %v1568_v17  ;;  %v1120_v22 = vadd.f32 %v1119_v18, %v1118_v19  ;;  %1342 = vmatmul.mubr.msk.f32.gmra.mrb[4].mxu1 %vm277_vm0, %v1568_v17 }
  0x1b   : > { %1326 = vmatprep.mubr.msk.f32.mxu0 %vm277_vm0, %v1574_v20  ;;  %1344 = vmatprep.mubr.msk.f32.mxu1 %vm277_vm0, %v1574_v20 }
  0x1c   : > { %v1122_v25 = vadd.f32 %v1121_v21, %v1120_v22 }
  0x1e   : > { %1327 = vmatmul.mubr.msk.f32.gmra.mrb[6].mxu0 %vm277_vm0, %v1580_v23  ;;  %v1124_v26 = vadd.f32 %v1123_v24, %v1122_v25  ;;  %1345 = vmatmul.mubr.msk.f32.gmra.mrb[6].mxu1 %vm277_vm0, %v1580_v23 }
  0x1f   : > { %1373 = vmatprep.mubr.msk.f32.mxu1 %vm277_vm0, %v259_v4 }
  0x20   : > { %v1125_v27 = vrot.slane %v1124_v26, 4 }
  0x22   : > { %v1126_v28 = vadd.f32 %v1125_v27, %v1124_v26 }
  0x24   : > { %v1127_v29 = vrot.slane %v1126_v28, 2 }
  0x26   : > { %v1128_v30 = vadd.f32 %v1127_v29, %v1126_v28 }
  0x28   : > { %v1129_v31 = vrot.slane %v1128_v30, 1 }
  0x2a   : > { %v1130_v32 = vadd.f32 %v1129_v31, %v1128_v30 }
  0x2c   : > { %1132 = vst.msk [vmem:[%s258_s12] sm:$0x1] %vm1131_vm1, %v1130_v32 }
  0xe5   : > { %v1319_v38 = vpop.f32.mrb[0].mxu0 }
  0xe6   : > { %v368_v39 = vpop.f32.mrb[1].mxu0  ;;  %v374_v41 = vadd.f32 %v1319_v38, %v1212_v37 }
  0xe7   : > { %v369_v40 = vadd.f32 %v1212_v37, %v368_v39 }
  0xe8   : > { %v414_v49 = vsel %vm410_vm2, %v374_v41, 0.0 }
  0xe9   : > { %v1322_v42 = vpop.f32.mrb[2].mxu0  ;;  %v411_v43 = vsel %vm410_vm2, %v369_v40, 0.0 }
  0xea   : > { %v378_v44 = vpop.f32.mrb[3].mxu0  ;;  %412 = vadd.xlane.f32.xlu0 %v411_v43  ;;  %v384_v46 = vadd.f32 %v1322_v42, %v1212_v37 }
  0xeb   : > { %v379_v45 = vadd.f32 %v1212_v37, %v378_v44 }
  0xec   : > { %v420_v54 = vsel %vm410_vm2, %v384_v46, 0.0 }
  0xed   : > { %v1325_v47 = vpop.f32.mrb[4].mxu0  ;;  %v417_v48 = vsel %vm410_vm2, %v379_v45, 0.0 }
  0xee   : > { %v388_v50 = vpop.f32.mrb[5].mxu0  ;;  %418 = vadd.xlane.f32.xlu1 %v417_v48  ;;  %415 = vadd.xlane.f32.xlu0 %v414_v49  ;;  %v394_v52 = vadd.f32 %v1325_v47, %v1212_v37  ;;  %v1677_v48 = vpop.f32.mrb[0].mxu1 }
  0xef   : > { %v389_v51 = vadd.f32 %v1212_v37, %v388_v50  ;;  %v1679_v49 = vpop.f32.mrb[1].mxu1  ;;  %v679_v50 = vld [vmem:[%s1865_s3 + $0x10] sm:$0xff] }
  0xf0   : > { %v426_v59 = vsel %vm410_vm2, %v394_v52, 0.0 }
  0xf1   : > { %v1328_v53 = vpop.f32.mrb[6].mxu0  ;;  %v423_v55 = vsel %vm410_vm2, %v389_v51, 0.0 }
  0xf2   : > { %v398_v56 = vpop.f32.mrb[7].mxu0  ;;  %421 = vadd.xlane.f32.xlu1 %v420_v54  ;;  %424 = vadd.xlane.f32.xlu0 %v423_v55  ;;  %v404_v58 = vadd.f32 %v1328_v53, %v1212_v37  ;;  %v1687_v53 = vpop.f32.mrb[2].mxu1 }
  0xf3   : > { %v399_v57 = vadd.f32 %v1212_v37, %v398_v56  ;;  %v1689_v54 = vpop.f32.mrb[3].mxu1 }
  0xf4   : > { %v432_v61 = vsel %vm410_vm2, %v404_v58, 0.0  ;;  %v1691_v55 = vpop.f32.mrb[4].mxu1 }
  0xf5   : > { %v429_v60 = vsel %vm410_vm2, %v399_v57, 0.0  ;;  %v1693_v56 = vpop.f32.mrb[5].mxu1 }
  0xf6   : > { %427 = vadd.xlane.f32.xlu1 %v426_v59  ;;  %430 = vadd.xlane.f32.xlu0 %v429_v60 }
  0xfa   : > { %433 = vadd.xlane.f32.xlu1 %v432_v61 }
 0x177   : > { %v413_v62 = vpop.xlane.xlu0 %412 }
 0x178   : > { %v436_v63 = vmul.f32 0.03125, %v413_v62 }
 0x17a   : > { %v1631_v0 = vsub.f32 %v369_v40, %v436_v63 }
 0x17b   : > { %v419_v1 = vpop.xlane.xlu1 %418  ;;  %v416_v2 = vpop.xlane.xlu0 %415 }
 0x17c   : > { %v438_v3 = vmul.f32 0.03125, %v419_v1  ;;  %v437_v4 = vmul.f32 0.03125, %v416_v2  ;;  %v452_v7 = vmul.f32 %v1631_v0, %v1631_v0 }
 0x17e   : > { %v1635_v8 = vsub.f32 %v379_v45, %v438_v3  ;;  %v1637_v9 = vsub.f32 %v374_v41, %v437_v4  ;;  %v460_v10 = vsel %vm410_vm2, %v452_v7, 0.0  ;;  %v677_v45 = vld [vmem:[%s1865_s3] sm:$0xff] }
 0x17f   : > { %v422_v12 = vpop.xlane.xlu1 %421  ;;  %461 = vadd.xlane.f32.xlu0 %v460_v10  ;;  %v425_v13 = vpop.xlane.xlu0 %424 }
 0x180   : > { %v439_v15 = vmul.f32 0.03125, %v422_v12  ;;  %v440_v16 = vmul.f32 0.03125, %v425_v13  ;;  %v454_v18 = vmul.f32 %v1635_v8, %v1635_v8  ;;  %v453_v19 = vmul.f32 %v1637_v9, %v1637_v9 }
 0x182   : > { %v1644_v21 = vsub.f32 %v384_v46, %v439_v15  ;;  %v1646_v22 = vsub.f32 %v389_v51, %v440_v16  ;;  %v466_v24 = vsel %vm410_vm2, %v454_v18, 0.0  ;;  %v463_v25 = vsel %vm410_vm2, %v453_v19, 0.0  ;;  %v678_v46 = vld [vmem:[%s1865_s3 + $0x8] sm:$0xff]  ;;  %v680_v51 = vld [vmem:[%s1865_s3 + $0x18] sm:$0xff] }
 0x183   : > { %v428_v26 = vpop.xlane.xlu1 %427  ;;  %467 = vadd.xlane.f32.xlu0 %v466_v24  ;;  %464 = vadd.xlane.f32.xlu1 %v463_v25  ;;  %v431_v27 = vpop.xlane.xlu0 %430  ;;  %v1393_v47 = vpack.c.bf16 %v678_v46, %v677_v45 }
 0x184   : > { %v441_v28 = vmul.f32 0.03125, %v428_v26  ;;  %v442_v29 = vmul.f32 0.03125, %v431_v27  ;;  %v455_v30 = vmul.f32 %v1644_v21, %v1644_v21  ;;  %v456_v31 = vmul.f32 %v1646_v22, %v1646_v22  ;;  %v1222_v27 = vld [vmem:[%s1866_s4] ss:$0 sm:$0xff] }
 0x185   : > { %1394 = vmatprep.subr.bf16.mxu0 %v1393_v47 }
 0x186   : > { %v1654_v32 = vsub.f32 %v394_v52, %v441_v28  ;;  %v1656_v33 = vsub.f32 %v399_v57, %v442_v29  ;;  %v469_v34 = vsel %vm410_vm2, %v455_v30, 0.0  ;;  %v472_v35 = vsel %vm410_vm2, %v456_v31, 0.0  ;;  %1396 = vmatpush3.bf16.msra.mxu0 %v1393_v47  ;;  %v1695_v57 = vpop.f32.mrb[6].mxu1 }
 0x187   : > { %v434_v36 = vpop.xlane.xlu1 %433  ;;  %470 = vadd.xlane.f32.xlu1 %v469_v34  ;;  %473 = vadd.xlane.f32.xlu0 %v472_v35  ;;  %v1397_v52 = vpack.c.bf16 %v680_v51, %v679_v50  ;;  %v1223_v35 = vld [vmem:[%s1866_s4 + $0x1] ss:$0 sm:$0xff] }
 0x188   : > { %v443_v37 = vmul.f32 0.03125, %v434_v36  ;;  %v457_v38 = vmul.f32 %v1654_v32, %v1654_v32  ;;  %v458_v39 = vmul.f32 %v1656_v33, %v1656_v33 }
 0x189   : > { %1398 = vmatprep.subr.bf16.mxu0 %v1397_v52 }
 0x18a   : > { %v1664_v40 = vsub.f32 %v404_v58, %v443_v37  ;;  %v475_v41 = vsel %vm410_vm2, %v457_v38, 0.0  ;;  %v478_v42 = vsel %vm410_vm2, %v458_v39, 0.0  ;;  %1400 = vmatpush3.bf16.msra.mxu0 %v1397_v52  ;;  %v1697_v58 = vpop.f32.mrb[7].mxu1 }
 0x18b   : > { %476 = vadd.xlane.f32.xlu1 %v475_v41  ;;  %479 = vadd.xlane.f32.xlu0 %v478_v42 }
 0x18c   : > { %v459_v43 = vmul.f32 %v1664_v40, %v1664_v40 }
 0x18e   : > { %v481_v44 = vsel %vm410_vm2, %v459_v43, 0.0 }
 0x18f   : > { %482 = vadd.xlane.f32.xlu1 %v481_v44 }
 0x20c   : > { %v462_v59 = vpop.xlane.xlu0 %461 }
 0x20d   : > { %v484_v60 = vmul.f32 0.03125, %v462_v59 }
 0x20f   : > { %v492_v61 = vadd.f32 1e-05, %v484_v60 }
 0x210   : > { %v465_v62 = vpop.xlane.xlu1 %464  ;;  %v468_v63 = vpop.xlane.xlu0 %467 }
 0x211   : > { %1413 = vrsqrt.f32 %v492_v61  ;;  %v485_v1 = vmul.f32 0.03125, %v465_v62  ;;  %v486_v2 = vmul.f32 0.03125, %v468_v63 }
 0x213   : > { %v493_v3 = vadd.f32 1e-05, %v485_v1  ;;  %v494_v4 = vadd.f32 1e-05, %v486_v2 }
 0x214   : > { %v471_v7 = vpop.xlane.xlu1 %470  ;;  %v474_v10 = vpop.xlane.xlu0 %473 }
 0x215   : > { %1415 = vrsqrt.f32 %v493_v3  ;;  %v487_v12 = vmul.f32 0.03125, %v471_v7  ;;  %v488_v13 = vmul.f32 0.03125, %v474_v10 }
 0x216   : > { %1417 = vrsqrt.f32 %v494_v4 }
 0x217   : > { %v495_v15 = vadd.f32 1e-05, %v487_v12  ;;  %v496_v16 = vadd.f32 1e-05, %v488_v13 }
 0x218   : > { %v477_v18 = vpop.xlane.xlu1 %476  ;;  %v480_v19 = vpop.xlane.xlu0 %479 }
 0x219   : > { %1419 = vrsqrt.f32 %v495_v15  ;;  %v489_v24 = vmul.f32 0.03125, %v477_v18  ;;  %v490_v25 = vmul.f32 0.03125, %v480_v19 }
 0x21a   : > { %1421 = vrsqrt.f32 %v496_v16 }
 0x21b   : > { %v1414_v26 = vpop.eup %1413  ;;  %v497_v28 = vadd.f32 1e-05, %v489_v24  ;;  %v498_v29 = vadd.f32 1e-05, %v490_v25 }
 0x21c   : > { %v508_v30 = vmul.f32 %v1414_v26, %v1631_v0  ;;  %v483_v31 = vpop.xlane.xlu1 %482 }
 0x21d   : > { %1423 = vrsqrt.f32 %v497_v28  ;;  %v491_v34 = vmul.f32 0.03125, %v483_v31 }
 0x21e   : > { %v522_v36 = vmul.f32 %v1222_v27, %v508_v30  ;;  %1425 = vrsqrt.f32 %v498_v29 }
 0x21f   : > { %v1416_v37 = vpop.eup %1415  ;;  %v499_v38 = vadd.f32 1e-05, %v491_v34 }
 0x220   : > { %v1418_v39 = vpop.eup %1417  ;;  %v509_v41 = vmul.f32 %v1416_v37, %v1637_v9  ;;  %v536_v42 = vadd.f32 %v1223_v35, %v522_v36  ;;  %v1228_v9 = vld [vmem:[%s1864_s2 + $0x1] ss:$0 sm:$0xff] }
 0x221   : > { %v510_v43 = vmul.f32 %v1418_v39, %v1635_v8  ;;  %1427 = vrsqrt.f32 %v499_v38  ;;  %v643_v26 = vadd.f32 %v1228_v9, %v1693_v56  ;;  %v653_v29 = vadd.f32 %v1228_v9, %v1697_v58  ;;  %v1252_v58 = vld [vmem:[%s1863_s1 + $0x38] sm:$0xff] }
 0x222   : > { %v523_v44 = vmul.f32 %v1222_v27, %v509_v41  ;;  %1429 = vtanh.f32 %v536_v42  ;;  %v648_v30 = vadd.f32 %v1691_v55, %v1228_v9  ;;  %v1251_v55 = vld [vmem:[%s1863_s1 + $0x30] sm:$0xff] }
 0x223   : > { %v1420_v0 = vpop.eup %1419  ;;  %v524_v45 = vmul.f32 %v1222_v27, %v510_v43  ;;  %v1401_v38 = vpack.c.bf16 %v1252_v58, %v1251_v55 }
 0x224   : > { %v1422_v46 = vpop.eup %1421  ;;  %v511_v47 = vmul.f32 %v1420_v0, %v1644_v21  ;;  %v537_v50 = vadd.f32 %v1223_v35, %v523_v44  ;;  %v623_v21 = vadd.f32 %v1228_v9, %v1679_v49 }
 0x225   : > { %v512_v51 = vmul.f32 %v1422_v46, %v1646_v22  ;;  %v538_v52 = vadd.f32 %v1223_v35, %v524_v45  ;;  %1402 = vmatprep.subr.bf16.mxu1 %v1401_v38 }
 0x226   : > { %v525_v59 = vmul.f32 %v1222_v27, %v511_v47  ;;  %1431 = vtanh.f32 %v537_v50  ;;  %1404 = vmatpush3.bf16.msra.mxu1 %v1401_v38 }
 0x227   : > { %v1424_v60 = vpop.eup %1423  ;;  %v526_v8 = vmul.f32 %v1222_v27, %v512_v51  ;;  %1433 = vtanh.f32 %v538_v52 }
 0x228   : > { %v1426_v61 = vpop.eup %1425  ;;  %v513_v62 = vmul.f32 %v1424_v60, %v1654_v32  ;;  %v539_v63 = vadd.f32 %v1223_v35, %v525_v59  ;;  %v633_v32 = vadd.f32 %v1228_v9, %v1689_v54 }
 0x229   : > { %v514_v1 = vmul.f32 %v1426_v61, %v1656_v33  ;;  %v540_v2 = vadd.f32 %v1223_v35, %v526_v8  ;;  %v628_v33 = vadd.f32 %v1677_v48, %v1228_v9 }
 0x22a   : > { %v527_v22 = vmul.f32 %v1222_v27, %v513_v62  ;;  %1435 = vtanh.f32 %v539_v63 }
 0x22b   : > { %v1428_v3 = vpop.eup %1427  ;;  %v528_v4 = vmul.f32 %v1222_v27, %v514_v1  ;;  %1437 = vtanh.f32 %v540_v2 }
 0x22c   : > { %v1430_v7 = vpop.eup %1429  ;;  %v515_v10 = vmul.f32 %v1428_v3, %v1664_v40  ;;  %v541_v12 = vadd.f32 %v1223_v35, %v527_v22  ;;  %v638_v40 = vadd.f32 %v1687_v53, %v1228_v9 }
 0x22d   : > { %v669_v13 = vadd.f32 %v1430_v7, %v623_v21  ;;  %v542_v15 = vadd.f32 %v1223_v35, %v528_v4 }
 0x22e   : > { %v529_v16 = vmul.f32 %v1222_v27, %v515_v10  ;;  %1439 = vtanh.f32 %v541_v12 }
 0x22f   : > { %1355 = vmatprep.mubr.msk.f32.mxu0 %vm410_vm2, %v669_v13  ;;  %1441 = vtanh.f32 %v542_v15 }
 0x230   : > { %v1432_v49 = vpop.eup %1431  ;;  %v543_v18 = vadd.f32 %v1223_v35, %v529_v16  ;;  %v658_v35 = vadd.f32 %v1695_v57, %v1228_v9  ;;  %v1253_v57 = vld [vmem:[%s1863_s1 + $0x40] sm:$0xff] }
 0x231   : > { %v1434_v19 = vpop.eup %1433  ;;  %v670_v24 = vadd.f32 %v1432_v49, %v628_v33  ;;  %1371 = vmatprep.subr.mxu1 %v1253_v57 }
 0x232   : > { %v671_v25 = vadd.f32 %v1434_v19, %v633_v32  ;;  %1443 = vtanh.f32 %v543_v18  ;;  %1372 = vmatpush3.msra.mxu1 %v1253_v57 }
 0x233   : > { %1356 = vmatmul.mubr.msk.f32.vlgmr.msra.gmra.mrb[8].mxu0 %vm410_vm2, %v670_v24  ;;  %1374 = vmatmul.mubr.msk.f32.vlgmr.msra.gmra.mrb[8].mxu1 %vm277_vm0, %v1543_v5  ;;  %v1238_v5 = vld [vmem:[%s1866_s4 + $0x5] ss:$0 sm:$0xff] }
 0x234   : > { %v1436_v27 = vpop.eup %1435  ;;  %1358 = vmatprep.mubr.msk.f32.mxu0 %vm410_vm2, %v671_v25  ;;  %1376 = vmatprep.mubr.msk.f32.mxu1 %vm277_vm0, %v1545_v6 }
 0x235   : > { %v1438_v54 = vpop.eup %1437  ;;  %v672_v48 = vadd.f32 %v1436_v27, %v638_v40 }
 0x236   : > { %v673_v28 = vadd.f32 %v1438_v54, %v643_v26 }
 0x237   : > { %1359 = vmatmul.mubr.msk.f32.gmra.mrb[10].mxu0 %vm410_vm2, %v672_v48  ;;  %1377 = vmatmul.mubr.msk.f32.gmra.mrb[10].mxu1 %vm277_vm0, %v1555_v11 }
 0x238   : > { %v1440_v31 = vpop.eup %1439  ;;  %1361 = vmatprep.mubr.msk.f32.mxu0 %vm410_vm2, %v673_v28  ;;  %1379 = vmatprep.mubr.msk.f32.mxu1 %vm277_vm0, %v1562_v14 }
 0x239   : > { %v1442_v56 = vpop.eup %1441  ;;  %v674_v34 = vadd.f32 %v1440_v31, %v648_v30 }
 0x23a   : > { %v675_v53 = vadd.f32 %v1442_v56, %v653_v29 }
 0x23b   : > { %1362 = vmatmul.mubr.msk.f32.gmra.mrb[12].mxu0 %vm410_vm2, %v674_v34  ;;  %1380 = vmatmul.mubr.msk.f32.gmra.mrb[12].mxu1 %vm277_vm0, %v1568_v17 }
 0x23c   : > { %v1444_v36 = vpop.eup %1443  ;;  %1364 = vmatprep.mubr.msk.f32.mxu0 %vm410_vm2, %v675_v53  ;;  %1382 = vmatprep.mubr.msk.f32.mxu1 %vm277_vm0, %v1574_v20 }
 0x23d   : > { %v676_v37 = vadd.f32 %v1444_v36, %v658_v35 }
 0x23f   : > { %1365 = vmatmul.mubr.msk.f32.gmra.mrb[14].mxu0 %vm410_vm2, %v676_v37  ;;  %1383 = vmatmul.mubr.msk.f32.gmra.mrb[14].mxu1 %vm277_vm0, %v1580_v23 }
 0x306   : > { %v1357_v6 = vpop.f32.mrb[8].mxu0 }
 0x307   : > { %v785_v39 = vadd.f32 %v1357_v6, %v1238_v5  ;;  %v779_v41 = vpop.f32.mrb[9].mxu0  ;;  %v1806_v6 = vpop.f32.mrb[8].mxu1 }
 0x308   : > { %v780_v11 = vadd.f32 %v1238_v5, %v779_v41 }
 0x309   : > { %v825_v42 = vsel %vm410_vm2, %v785_v39, 0.0 }
 0x30a   : > { %826 = vadd.xlane.f32.xlu1 %v825_v42  ;;  %v1360_v14 = vpop.f32.mrb[10].mxu0  ;;  %v822_v17 = vsel %vm410_vm2, %v780_v11, 0.0 }
 0x30b   : > { %v795_v43 = vadd.f32 %v1360_v14, %v1238_v5  ;;  %823 = vadd.xlane.f32.xlu0 %v822_v17  ;;  %v789_v20 = vpop.f32.mrb[11].mxu0 }
 0x30c   : > { %v790_v44 = vadd.f32 %v1238_v5, %v789_v20 }
 0x30d   : > { %v831_v23 = vsel %vm410_vm2, %v795_v43, 0.0 }
 0x30e   : > { %832 = vadd.xlane.f32.xlu1 %v831_v23  ;;  %v1363_v0 = vpop.f32.mrb[12].mxu0  ;;  %v828_v45 = vsel %vm410_vm2, %v790_v44, 0.0 }
 0x30f   : > { %v805_v46 = vadd.f32 %v1363_v0, %v1238_v5  ;;  %829 = vadd.xlane.f32.xlu0 %v828_v45  ;;  %v799_v47 = vpop.f32.mrb[13].mxu0 }
 0x310   : > { %v800_v50 = vadd.f32 %v1238_v5, %v799_v47 }
 0x311   : > { %v837_v51 = vsel %vm410_vm2, %v805_v46, 0.0 }
 0x312   : > { %838 = vadd.xlane.f32.xlu1 %v837_v51  ;;  %v1366_v52 = vpop.f32.mrb[14].mxu0  ;;  %v834_v59 = vsel %vm410_vm2, %v800_v50, 0.0 }
 0x313   : > { %v815_v9 = vadd.f32 %v1366_v52, %v1238_v5  ;;  %835 = vadd.xlane.f32.xlu0 %v834_v59  ;;  %v809_v60 = vpop.f32.mrb[15].mxu0 }
 0x314   : > { %v810_v8 = vadd.f32 %v1238_v5, %v809_v60 }
 0x315   : > { %v843_v61 = vsel %vm410_vm2, %v815_v9, 0.0 }
 0x316   : > { %844 = vadd.xlane.f32.xlu1 %v843_v61  ;;  %v840_v62 = vsel %vm410_vm2, %v810_v8, 0.0 }
 0x317   : > { %841 = vadd.xlane.f32.xlu0 %v840_v62 }
 0x397   : > { %v827_v63 = vpop.xlane.xlu1 %826 }
 0x398   : > { %v847_v1 = vmul.f32 0.03125, %v827_v63  ;;  %v824_v21 = vpop.xlane.xlu0 %823 }
 0x399   : > { %v846_v2 = vmul.f32 0.03125, %v824_v21 }
 0x39a   : > { %v1766_v22 = vsub.f32 %v785_v39, %v847_v1  ;;  %v1808_v39 = vpop.f32.mrb[9].mxu1 }
 0x39b   : > { %v1768_v3 = vsub.f32 %v780_v11, %v846_v2  ;;  %v833_v4 = vpop.xlane.xlu1 %832  ;;  %v1810_v41 = vpop.f32.mrb[10].mxu1 }
 0x39c   : > { %v849_v7 = vmul.f32 0.03125, %v833_v4  ;;  %v830_v10 = vpop.xlane.xlu0 %829  ;;  %v863_v12 = vmul.f32 %v1766_v22, %v1766_v22  ;;  %v1812_v11 = vpop.f32.mrb[11].mxu1 }
 0x39d   : > { %v848_v13 = vmul.f32 0.03125, %v830_v10  ;;  %v862_v15 = vmul.f32 %v1768_v3, %v1768_v3  ;;  %v1814_v42 = vpop.f32.mrb[12].mxu1 }
 0x39e   : > { %v1774_v16 = vsub.f32 %v795_v43, %v849_v7  ;;  %v873_v32 = vsel %vm410_vm2, %v863_v12, 0.0  ;;  %v1816_v14 = vpop.f32.mrb[13].mxu1  ;;  %v1249_v12 = vld [vmem:[%s1866_s4 + $0x3] ss:$0 sm:$0xff] }
 0x39f   : > { %v1777_v33 = vsub.f32 %v790_v44, %v848_v13  ;;  %v839_v49 = vpop.xlane.xlu1 %838  ;;  %874 = vadd.xlane.f32.xlu1 %v873_v32  ;;  %v870_v18 = vsel %vm410_vm2, %v862_v15, 0.0  ;;  %v1818_v17 = vpop.f32.mrb[14].mxu1 }
 0x3a0   : > { %v851_v19 = vmul.f32 0.03125, %v839_v49  ;;  %871 = vadd.xlane.f32.xlu0 %v870_v18  ;;  %v836_v24 = vpop.xlane.xlu0 %835  ;;  %v865_v25 = vmul.f32 %v1774_v16, %v1774_v16  ;;  %v1820_v43 = vpop.f32.mrb[15].mxu1 }
 0x3a1   : > { %v850_v26 = vmul.f32 0.03125, %v836_v24  ;;  %v864_v40 = vmul.f32 %v1777_v33, %v1777_v33 }
 0x3a2   : > { %v1784_v27 = vsub.f32 %v805_v46, %v851_v19  ;;  %v879_v54 = vsel %vm410_vm2, %v865_v25, 0.0  ;;  %v1250_v19 = vld [vmem:[%s1866_s4 + $0x4] ss:$0 sm:$0xff] }
 0x3a3   : > { %v1787_v48 = vsub.f32 %v800_v50, %v850_v26  ;;  %880 = vadd.xlane.f32.xlu1 %v879_v54  ;;  %v845_v28 = vpop.xlane.xlu1 %844  ;;  %v876_v29 = vsel %vm410_vm2, %v864_v40, 0.0 }
 0x3a4   : > { %v853_v30 = vmul.f32 0.03125, %v845_v28  ;;  %877 = vadd.xlane.f32.xlu0 %v876_v29  ;;  %v842_v31 = vpop.xlane.xlu0 %841  ;;  %v867_v56 = vmul.f32 %v1784_v27, %v1784_v27 }
 0x3a5   : > { %v852_v34 = vmul.f32 0.03125, %v842_v31  ;;  %v866_v53 = vmul.f32 %v1787_v48, %v1787_v48 }
 0x3a6   : > { %v1794_v35 = vsub.f32 %v815_v9, %v853_v30  ;;  %v885_v36 = vsel %vm410_vm2, %v867_v56, 0.0 }
 0x3a7   : > { %v1797_v37 = vsub.f32 %v810_v8, %v852_v34  ;;  %886 = vadd.xlane.f32.xlu1 %v885_v36  ;;  %v882_v55 = vsel %vm410_vm2, %v866_v53, 0.0 }
 0x3a8   : > { %883 = vadd.xlane.f32.xlu0 %v882_v55  ;;  %v869_v58 = vmul.f32 %v1794_v35, %v1794_v35 }
 0x3a9   : > { %v868_v38 = vmul.f32 %v1797_v37, %v1797_v37 }
 0x3aa   : > { %v891_v57 = vsel %vm410_vm2, %v869_v58, 0.0 }
 0x3ab   : > { %892 = vadd.xlane.f32.xlu1 %v891_v57  ;;  %v888_v5 = vsel %vm410_vm2, %v868_v38, 0.0 }
 0x3ac   : > { %889 = vadd.xlane.f32.xlu0 %v888_v5 }
 0x42c   : > { %v875_v20 = vpop.xlane.xlu1 %874 }
 0x42d   : > { %v895_v44 = vmul.f32 0.03125, %v875_v20  ;;  %v872_v23 = vpop.xlane.xlu0 %871 }
 0x42e   : > { %v894_v0 = vmul.f32 0.03125, %v872_v23 }
 0x42f   : > { %v903_v45 = vadd.f32 1e-05, %v895_v44 }
 0x430   : > { %v902_v46 = vadd.f32 1e-05, %v894_v0  ;;  %v881_v47 = vpop.xlane.xlu1 %880 }
 0x431   : > { %1445 = vrsqrt.f32 %v903_v45  ;;  %v897_v50 = vmul.f32 0.03125, %v881_v47  ;;  %v878_v51 = vpop.xlane.xlu0 %877 }
 0x432   : > { %1447 = vrsqrt.f32 %v902_v46  ;;  %v896_v52 = vmul.f32 0.03125, %v878_v51 }
 0x433   : > { %v905_v59 = vadd.f32 1e-05, %v897_v50 }
 0x434   : > { %v904_v9 = vadd.f32 1e-05, %v896_v52  ;;  %v887_v60 = vpop.xlane.xlu1 %886 }
 0x435   : > { %1449 = vrsqrt.f32 %v905_v59  ;;  %v899_v8 = vmul.f32 0.03125, %v887_v60  ;;  %v884_v61 = vpop.xlane.xlu0 %883 }
 0x436   : > { %1451 = vrsqrt.f32 %v904_v9  ;;  %v898_v62 = vmul.f32 0.03125, %v884_v61 }
 0x437   : > { %v907_v63 = vadd.f32 1e-05, %v899_v8 }
 0x438   : > { %v906_v1 = vadd.f32 1e-05, %v898_v62  ;;  %v893_v21 = vpop.xlane.xlu1 %892 }
 0x439   : > { %1453 = vrsqrt.f32 %v907_v63  ;;  %v901_v2 = vmul.f32 0.03125, %v893_v21  ;;  %v890_v4 = vpop.xlane.xlu0 %889 }
 0x43a   : > { %1455 = vrsqrt.f32 %v906_v1  ;;  %v900_v7 = vmul.f32 0.03125, %v890_v4 }
 0x43b   : > { %v1446_v10 = vpop.eup %1445  ;;  %v909_v13 = vadd.f32 1e-05, %v901_v2 }
 0x43c   : > { %v1448_v15 = vpop.eup %1447  ;;  %v919_v32 = vmul.f32 %v1446_v10, %v1766_v22  ;;  %v908_v49 = vadd.f32 1e-05, %v900_v7 }
 0x43d   : > { %v918_v18 = vmul.f32 %v1448_v15, %v1768_v3  ;;  %1457 = vrsqrt.f32 %v909_v13 }
 0x43e   : > { %v933_v24 = vmul.f32 %v1249_v12, %v919_v32  ;;  %1459 = vrsqrt.f32 %v908_v49 }
 0x43f   : > { %v1450_v25 = vpop.eup %1449  ;;  %v932_v26 = vmul.f32 %v1249_v12, %v918_v18 }
 0x440   : > { %v1452_v40 = vpop.eup %1451  ;;  %v921_v54 = vmul.f32 %v1450_v25, %v1774_v16  ;;  %v947_v28 = vadd.f32 %v1250_v19, %v933_v24  ;;  %v1255_v16 = vld [vmem:[%s1864_s2 + $0x2] ss:$0 sm:$0xff] }
 0x441   : > { %v920_v29 = vmul.f32 %v1452_v40, %v1777_v33  ;;  %v946_v30 = vadd.f32 %v1250_v19, %v932_v26  ;;  %v1033_v0 = vadd.f32 %v1255_v16, %v1808_v39  ;;  %v1043_v9 = vadd.f32 %v1255_v16, %v1812_v11 }
 0x442   : > { %v935_v22 = vmul.f32 %v1249_v12, %v921_v54  ;;  %1461 = vtanh.f32 %v947_v28  ;;  %v1058_v63 = vadd.f32 %v1814_v42, %v1255_v16  ;;  %v1053_v1 = vadd.f32 %v1255_v16, %v1816_v14 }
 0x443   : > { %v1454_v31 = vpop.eup %1453  ;;  %v934_v3 = vmul.f32 %v1249_v12, %v920_v29  ;;  %1463 = vtanh.f32 %v946_v30  ;;  %v1068_v4 = vadd.f32 %v1818_v17, %v1255_v16  ;;  %v1063_v13 = vadd.f32 %v1255_v16, %v1820_v43 }
 0x444   : > { %v1456_v56 = vpop.eup %1455  ;;  %v923_v34 = vmul.f32 %v1454_v31, %v1784_v27  ;;  %v949_v53 = vadd.f32 %v1250_v19, %v935_v22  ;;  %v1038_v27 = vadd.f32 %v1806_v6, %v1255_v16 }
 0x445   : > { %v922_v36 = vmul.f32 %v1456_v56, %v1787_v48  ;;  %v948_v55 = vadd.f32 %v1250_v19, %v934_v3 }
 0x446   : > { %v937_v58 = vmul.f32 %v1249_v12, %v923_v34  ;;  %1465 = vtanh.f32 %v949_v53 }
 0x447   : > { %v1458_v33 = vpop.eup %1457  ;;  %v936_v38 = vmul.f32 %v1249_v12, %v922_v36  ;;  %1467 = vtanh.f32 %v948_v55 }
 0x448   : > { %v1460_v57 = vpop.eup %1459  ;;  %v925_v5 = vmul.f32 %v1458_v33, %v1794_v35  ;;  %v951_v20 = vadd.f32 %v1250_v19, %v937_v58  ;;  %v1048_v35 = vadd.f32 %v1810_v41, %v1255_v16 }
 0x449   : > { %v924_v44 = vmul.f32 %v1460_v57, %v1797_v37  ;;  %v950_v23 = vadd.f32 %v1250_v19, %v936_v38 }
 0x44a   : > { %v939_v48 = vmul.f32 %v1249_v12, %v925_v5  ;;  %1469 = vtanh.f32 %v951_v20 }
 0x44b   : > { %v938_v45 = vmul.f32 %v1249_v12, %v924_v44  ;;  %1471 = vtanh.f32 %v950_v23 }
 0x44c   : > { %v1462_v46 = vpop.eup %1461  ;;  %v953_v47 = vadd.f32 %v1250_v19, %v939_v48 }
 0x44d   : > { %v1464_v50 = vpop.eup %1463  ;;  %v1080_v51 = vadd.f32 %v1462_v46, %v1038_v27  ;;  %v952_v52 = vadd.f32 %v1250_v19, %v938_v45 }
 0x44e   : > { %v1079_v59 = vadd.f32 %v1464_v50, %v1033_v0  ;;  %1473 = vtanh.f32 %v953_v47 }
 0x44f   : > { %v1088_v37 = vsel %vm410_vm2, %v1080_v51, 0.0  ;;  %1475 = vtanh.f32 %v952_v52 }
 0x450   : > { %v1466_v6 = vpop.eup %1465  ;;  %v1087_v39 = vsel %vm410_vm2, %v1079_v59, 0.0 }
 0x451   : > { %v1468_v60 = vpop.eup %1467  ;;  %v1089_v8 = vadd.f32 %v1088_v37, %v1087_v39  ;;  %v1082_v61 = vadd.f32 %v1466_v6, %v1048_v35 }
 0x452   : > { %v1081_v62 = vadd.f32 %v1468_v60, %v1043_v9 }
 0x453   : > { %v1092_v7 = vsel %vm410_vm2, %v1082_v61, 0.0 }
 0x454   : > { %v1470_v21 = vpop.eup %1469  ;;  %v1090_v41 = vsel %vm410_vm2, %v1081_v62, 0.0 }
 0x455   : > { %v1472_v2 = vpop.eup %1471  ;;  %v1091_v11 = vadd.f32 %v1090_v41, %v1089_v8  ;;  %v1084_v10 = vadd.f32 %v1470_v21, %v1058_v63 }
 0x456   : > { %v1083_v12 = vadd.f32 %v1472_v2, %v1053_v1 }
 0x457   : > { %v1093_v15 = vadd.f32 %v1092_v7, %v1091_v11  ;;  %v1096_v18 = vsel %vm410_vm2, %v1084_v10, 0.0 }
 0x458   : > { %v1474_v32 = vpop.eup %1473  ;;  %v1094_v49 = vsel %vm410_vm2, %v1083_v12, 0.0 }
 0x459   : > { %v1476_v42 = vpop.eup %1475  ;;  %v1095_v14 = vadd.f32 %v1094_v49, %v1093_v15  ;;  %v1086_v19 = vadd.f32 %v1474_v32, %v1068_v4 }
 0x45a   : > { %v1085_v24 = vadd.f32 %v1476_v42, %v1063_v13 }
 0x45b   : > { %v1097_v25 = vadd.f32 %v1096_v18, %v1095_v14  ;;  %v1100_v40 = vsel %vm410_vm2, %v1086_v19, 0.0 }
 0x45c   : > { %v1098_v17 = vsel %vm410_vm2, %v1085_v24, 0.0 }
 0x45d   : > { %v1099_v26 = vadd.f32 %v1098_v17, %v1097_v25 }
 0x45f   : > { %v1101_v54 = vadd.f32 %v1100_v40, %v1099_v26 }
 0x461   : > { %v1102_v28 = vrot.slane %v1101_v54, 4 }
 0x463   : > { %v1103_v43 = vadd.f32 %v1102_v28, %v1101_v54 }
 0x465   : > { %v1104_v29 = vrot.slane %v1103_v43, 2 }
 0x467   : > { %v1105_v30 = vadd.f32 %v1104_v29, %v1103_v43 }
 0x469   : > { %v1106_v22 = vrot.slane %v1105_v30, 1 }
 0x46b   : > { %v1107_v31 = vadd.f32 %v1106_v22, %v1105_v30 }
 0x46d   : > { %1109 = vst.msk [vmem:[%s255_s7] sm:$0x1] %vm1108_vm3, %v1107_v31 }
 0x46e PF: > { %s17_s21 = sadd.s32 1, %s1483_s21  }
 0x46f   : > { %p14_p5 = scmp.ge.s32.totalorder %s17_s21, 6  }
 0x471   :  { %16 = sbr.rel (!%p14_p5) target bundleno = 1 (0x1), region = 90 }

</bundles_post_ra>
